<compile_context>
chip_gen: v7x
topology: tpu7x:2x2x1
jax: 0.10.0
libtpu: 0.0.40
codegen_flags: <defaults>
</compile_context>

<pallas_src>
import functools

import jax
import jax.numpy as jnp
from jax.experimental import pallas as pl
from jax.experimental.pallas import tpu as pltpu


def _round_up(x, m):
    return ((x + m - 1) // m) * m


def _device_flags():
    """Returns (pre_v6, multi_tc, known) resolved from the local TPU generation."""
    kind = ""
    try:
        kind = jax.devices()[0].device_kind.lower()
    except Exception:
        pass
    known = bool(kind)
    pre_v6 = any(t in kind for t in ("v2", "v3", "v4", "v5"))
    multi_tc = ("v7" in kind) or ("7x" in kind)
    return pre_v6, multi_tc, known


def _qpredictor_kernel(x_ref, w1_ref, b1_ref, w2_ref, b2_ref, w3_ref, b3_ref, o_ref,
                       *, bf16_matmul, bf16_tanh):
    mm_dt = jnp.bfloat16 if bf16_matmul else jnp.float32
    act_dt = jnp.bfloat16 if bf16_tanh else jnp.float32

    x = x_ref[...].astype(mm_dt)                       # (S, tile): batch on lanes
    w1 = w1_ref[...].astype(mm_dt)                     # (H1, S)
    w2 = w2_ref[...].astype(mm_dt)                     # (H2, H1)
    w3 = w3_ref[...].astype(mm_dt)                     # (A_pad, H2)

    pre1 = jnp.dot(w1, x, preferred_element_type=jnp.float32) + b1_ref[...]
    h1 = jnp.tanh(pre1.astype(act_dt)).astype(mm_dt)   # bf16 EUP path on v6e/v7x
    pre2 = jnp.dot(w2, h1, preferred_element_type=jnp.float32) + b2_ref[...]
    h2 = jnp.tanh(pre2.astype(act_dt)).astype(mm_dt)
    out = jnp.dot(w3, h2, preferred_element_type=jnp.float32) + b3_ref[...]
    o_ref[...] = out.astype(o_ref.dtype)


@functools.partial(jax.jit, static_argnames=("batch_tile", "low_precision"))
def qpredictor_forward_t(state_t, params, *, batch_tile=16384, low_precision=None):
    """Transpose-free hot path: state_t is (state_size, B); returns (num_actions, B)."""
    w1, b1, w2, b2, w3, b3 = params
    S, B = state_t.shape
    H1 = w1.shape[0]
    H2 = w2.shape[0]
    A = w3.shape[0]

    pre_v6, multi_tc, known = _device_flags()
    if low_precision is None:
        low_precision = known and not pre_v6           # bf16 on v6e/v7x, f32 otherwise
    bf16_matmul = bool(low_precision)
    bf16_tanh = bool(low_precision) and not pre_v6     # no bf16 VPU/EUP before v6e

    # --- batch tiling: big lane-aligned tiles; >=2 grid steps on multi-TC chips -----
    b128 = _round_up(B, 128)
    tile = max(128, (min(int(batch_tile), 32768) // 128) * 128)
    tile = min(tile, b128)
    if multi_tc and b128 >= 256:
        # Keep at least two "parallel" grid steps so the second TensorCore gets work.
        tile = min(tile, _round_up(pl.cdiv(b128, 2), 128))
    Bp = _round_up(B, tile)
    if Bp != B:
        state_t = jnp.pad(state_t, ((0, 0), (0, Bp - B)))

    # --- pad output feature dim to a full 8-sublane tile (unmasked writeback) -------
    A_pad = _round_up(A, 8)
    if A_pad != A:
        w3 = jnp.pad(w3, ((0, A_pad - A), (0, 0)))
        b3 = jnp.pad(b3, ((0, A_pad - A),))

    # Biases as (out, 1) columns so they broadcast over the lane (batch) axis.
    b1c = b1.reshape(H1, 1)
    b2c = b2.reshape(H2, 1)
    b3c = b3.reshape(A_pad, 1)

    kernel = functools.partial(_qpredictor_kernel,
                               bf16_matmul=bf16_matmul, bf16_tanh=bf16_tanh)

    flops = 2 * Bp * (S * H1 + H1 * H2 + H2 * A_pad)
    transcendentals = Bp * (H1 + H2)
    bytes_accessed = 4 * (Bp * S + Bp * A_pad + w1.size + w2.size + w3.size
                          + H1 + H2 + A_pad)

    out_t = pl.pallas_call(
        kernel,
        out_shape=jax.ShapeDtypeStruct((A_pad, Bp), jnp.float32),
        grid_spec=pltpu.PrefetchScalarGridSpec(
            num_scalar_prefetch=0,
            grid=(Bp // tile,),
            in_specs=[
                pl.BlockSpec((S, tile), lambda i: (0, i)),     # x tile (batch on lanes)
                pl.BlockSpec((H1, S), lambda i: (0, 0)),       # W1 (out, in), resident
                pl.BlockSpec((H1, 1), lambda i: (0, 0)),       # b1
                pl.BlockSpec((H2, H1), lambda i: (0, 0)),      # W2
                pl.BlockSpec((H2, 1), lambda i: (0, 0)),       # b2
                pl.BlockSpec((A_pad, H2), lambda i: (0, 0)),   # W3 (padded to 8 rows)
                pl.BlockSpec((A_pad, 1), lambda i: (0, 0)),    # b3
            ],
            out_specs=pl.BlockSpec((A_pad, tile), lambda i: (0, i)),
        ),
        compiler_params=pltpu.CompilerParams(
            dimension_semantics=("parallel",),
        ),
        cost_estimate=pl.CostEstimate(
            flops=flops,
            transcendentals=transcendentals,
            bytes_accessed=bytes_accessed,
        ),
    )(state_t, w1, b1c, w2, b2c, w3, b3c)

    return out_t[:A, :B]


@functools.partial(jax.jit, static_argnames=("batch_tile", "low_precision"))
def qpredictor_forward(state, params, *, batch_tile=16384, low_precision=None):
    """nn.Module-compatible interface: (B, state_size) f32 -> (B, num_actions) f32.

    The transposes here are interface plumbing only; prefer qpredictor_forward_t for
    the hot loop to avoid the extra HBM passes.
    """
    out_t = qpredictor_forward_t(state.T, params,
                                 batch_tile=batch_tile, low_precision=low_precision)
    return out_t.T


def init_qpredictor_params(key, state_size, num_actions, hidden=16):
    """nn.Linear-style init U(-1/sqrt(fan_in), 1/sqrt(fan_in)).

    Weights stored PyTorch-native (out_features, in_features); biases (out_features,).
    """
    def linear(k, fan_in, fan_out):
        kw, kb = jax.random.split(k)
        bound = 1.0 / jnp.sqrt(fan_in)
        w = jax.random.uniform(kw, (fan_out, fan_in), jnp.float32, -bound, bound)
        b = jax.random.uniform(kb, (fan_out,), jnp.float32, -bound, bound)
        return w, b

    k1, k2, k3 = jax.random.split(key, 3)
    w1, b1 = linear(k1, state_size, hidden)
    w2, b2 = linear(k2, hidden, hidden)
    w3, b3 = linear(k3, hidden, num_actions)
    return (w1, b1, w2, b2, w3, b3)


def qpredictor_reference(state, params):
    w1, b1, w2, b2, w3, b3 = params
    x = jnp.tanh(state @ w1.T + b1)
    x = jnp.tanh(x @ w2.T + b2)
    return x @ w3.T + b3


if __name__ == "__main__":
    # MountainCar-like sizes: state_size=2, num_actions=3.
    STATE_SIZE = 2
    NUM_ACTIONS = 3
    BATCH = 8

    key = jax.random.PRNGKey(0)
    k_params, k_state = jax.random.split(key)

    params = init_qpredictor_params(k_params, STATE_SIZE, NUM_ACTIONS)
    state = jax.random.normal(k_state, (BATCH, STATE_SIZE), jnp.float32)

    # 1) Strict parity vs the f32 reference using the full-precision path.
    out = jax.block_until_ready(qpredictor_forward(state, params, low_precision=False))
    ref = qpredictor_reference(state, params)
    assert out.shape == (BATCH, NUM_ACTIONS)
    assert jnp.allclose(out, ref, atol=2e-5, rtol=1e-5), "mismatch vs reference (f32)"

    # 2) Default (generation-gated, possibly bf16) path on a multi-tile batch.
    pre_v6, _, known = _device_flags()
    lp_default = known and not pre_v6
    atol, rtol = (1e-1, 1e-1) if lp_default else (2e-5, 1e-5)

    big_state = jax.random.normal(jax.random.PRNGKey(1), (300, STATE_SIZE), jnp.float32)
    big_out = jax.block_until_ready(qpredictor_forward(big_state, params, batch_tile=128))
    big_ref = qpredictor_reference(big_state, params)
    assert big_out.shape == (300, NUM_ACTIONS)
    assert jnp.allclose(big_out, big_ref, atol=atol, rtol=rtol), "mismatch (default path)"

    # 3) Transpose-free SoA hot path: (S, B) in -> (A, B) out, no wrapper transposes.
    soa_out = jax.block_until_ready(qpredictor_forward_t(big_state.T, params))
    assert soa_out.shape == (NUM_ACTIONS, 300)
    assert jnp.allclose(soa_out.T, big_ref, atol=atol, rtol=rtol), "mismatch (SoA path)"

    print("KERNEL_OK")
</pallas_src>

<mosaic_0001>
module attributes {stable_mosaic.version = 11 : i64} {
  func.func @_qpredictor_kernel(%arg0: i32, %arg1: memref<2x128xf32, #tpu.memory_space<vmem>>, %arg2: memref<16x2xf32, #tpu.memory_space<vmem>>, %arg3: memref<16x1xf32, #tpu.memory_space<vmem>>, %arg4: memref<16x16xf32, #tpu.memory_space<vmem>>, %arg5: memref<16x1xf32, #tpu.memory_space<vmem>>, %arg6: memref<8x16xf32, #tpu.memory_space<vmem>>, %arg7: memref<8x1xf32, #tpu.memory_space<vmem>>, %arg8: memref<8x128xf32, #tpu.memory_space<vmem>>) attributes {dimension_semantics = [#tpu.dimension_semantics<parallel>], iteration_bounds = array<i64: 1>, scalar_prefetch = 0 : i64, scratch_operands = 0 : i64, tpu.core_type = #tpu.core_type<tc>, window_params = [{transform_indices = @transform_0, window_bounds = array<i64: 2, 128>}, {pipeline_mode = #tpu.pipeline_mode<synchronous>, transform_indices = @transform_1, window_bounds = array<i64: 16, 2>}, {pipeline_mode = #tpu.pipeline_mode<synchronous>, transform_indices = @transform_2, window_bounds = array<i64: 16, 1>}, {pipeline_mode = #tpu.pipeline_mode<synchronous>, transform_indices = @transform_3, window_bounds = array<i64: 16, 16>}, {pipeline_mode = #tpu.pipeline_mode<synchronous>, transform_indices = @transform_4, window_bounds = array<i64: 16, 1>}, {pipeline_mode = #tpu.pipeline_mode<synchronous>, transform_indices = @transform_5, window_bounds = array<i64: 8, 16>}, {pipeline_mode = #tpu.pipeline_mode<synchronous>, transform_indices = @transform_6, window_bounds = array<i64: 8, 1>}, {transform_indices = @transform_7, window_bounds = array<i64: 8, 128>}]} {
    %c0 = arith.constant 0 : index
    %c0_0 = arith.constant 0 : index
    %0 = vector.load %arg1[%c0, %c0_0] : memref<2x128xf32, #tpu.memory_space<vmem>>, vector<2x128xf32>
    %c0_1 = arith.constant 0 : index
    %c0_2 = arith.constant 0 : index
    %1 = vector.load %arg2[%c0_1, %c0_2] : memref<16x2xf32, #tpu.memory_space<vmem>>, vector<16x2xf32>
    %c0_3 = arith.constant 0 : index
    %c0_4 = arith.constant 0 : index
    %2 = vector.load %arg4[%c0_3, %c0_4] : memref<16x16xf32, #tpu.memory_space<vmem>>, vector<16x16xf32>
    %c0_5 = arith.constant 0 : index
    %c0_6 = arith.constant 0 : index
    %3 = vector.load %arg6[%c0_5, %c0_6] : memref<8x16xf32, #tpu.memory_space<vmem>>, vector<8x16xf32>
    %cst = arith.constant dense<0.000000e+00> : vector<16x128xf32>
    %4 = tpu.matmul %1, %0, %cst {dimension_numbers = #tpu.dot_dimension_numbers<[1], [0], [0], [1], [0, 0, 1, 1], [], []>} : vector<16x2xf32>, vector<2x128xf32>, vector<16x128xf32> -> vector<16x128xf32>
    %c0_7 = arith.constant 0 : index
    %c0_8 = arith.constant 0 : index
    %5 = vector.load %arg3[%c0_7, %c0_8] : memref<16x1xf32, #tpu.memory_space<vmem>>, vector<16x1xf32>
    %6 = vector.broadcast %5 : vector<16x1xf32> to vector<16x128xf32>
    %7 = arith.addf %4, %6 : vector<16x128xf32>
    %8 = math.tanh %7 : vector<16x128xf32>
    %cst_9 = arith.constant dense<0.000000e+00> : vector<16x128xf32>
    %9 = tpu.matmul %2, %8, %cst_9 {dimension_numbers = #tpu.dot_dimension_numbers<[1], [0], [0], [1], [0, 0, 1, 1], [], []>} : vector<16x16xf32>, vector<16x128xf32>, vector<16x128xf32> -> vector<16x128xf32>
    %c0_10 = arith.constant 0 : index
    %c0_11 = arith.constant 0 : index
    %10 = vector.load %arg5[%c0_10, %c0_11] : memref<16x1xf32, #tpu.memory_space<vmem>>, vector<16x1xf32>
    %11 = vector.broadcast %10 : vector<16x1xf32> to vector<16x128xf32>
    %12 = arith.addf %9, %11 : vector<16x128xf32>
    %13 = math.tanh %12 : vector<16x128xf32>
    %cst_12 = arith.constant dense<0.000000e+00> : vector<8x128xf32>
    %14 = tpu.matmul %3, %13, %cst_12 {dimension_numbers = #tpu.dot_dimension_numbers<[1], [0], [0], [1], [0, 0, 1, 1], [], []>} : vector<8x16xf32>, vector<16x128xf32>, vector<8x128xf32> -> vector<8x128xf32>
    %c0_13 = arith.constant 0 : index
    %c0_14 = arith.constant 0 : index
    %15 = vector.load %arg7[%c0_13, %c0_14] : memref<8x1xf32, #tpu.memory_space<vmem>>, vector<8x1xf32>
    %16 = vector.broadcast %15 : vector<8x1xf32> to vector<8x128xf32>
    %17 = arith.addf %14, %16 : vector<8x128xf32>
    %c0_15 = arith.constant 0 : index
    %c0_16 = arith.constant 0 : index
    %18 = vector.load %arg8[%c0_15, %c0_16] : memref<8x128xf32, #tpu.memory_space<vmem>>, vector<8x128xf32>
    tpu.vector_store %arg8[%c0_15, %c0_16], %17 {strides = array<i32>} : memref<8x128xf32, #tpu.memory_space<vmem>>, vector<8x128xf32>,
    return
  }
  func.func @transform_0(%arg0: i32) -> (i32, i32) {
    %c0_i32 = arith.constant 0 : i32
    %c0_i32_0 = arith.constant 0 : i32
    return %c0_i32, %arg0 : i32, i32
  }
  func.func @transform_1(%arg0: i32) -> (i32, i32) {
    %c0_i32 = arith.constant 0 : i32
    %c0_i32_0 = arith.constant 0 : i32
    %c0_i32_1 = arith.constant 0 : i32
    return %c0_i32, %c0_i32_0 : i32, i32
  }
  func.func @transform_2(%arg0: i32) -> (i32, i32) {
    %c0_i32 = arith.constant 0 : i32
    %c0_i32_0 = arith.constant 0 : i32
    %c0_i32_1 = arith.constant 0 : i32
    return %c0_i32, %c0_i32_0 : i32, i32
  }
  func.func @transform_3(%arg0: i32) -> (i32, i32) {
    %c0_i32 = arith.constant 0 : i32
    %c0_i32_0 = arith.constant 0 : i32
    %c0_i32_1 = arith.constant 0 : i32
    return %c0_i32, %c0_i32_0 : i32, i32
  }
  func.func @transform_4(%arg0: i32) -> (i32, i32) {
    %c0_i32 = arith.constant 0 : i32
    %c0_i32_0 = arith.constant 0 : i32
    %c0_i32_1 = arith.constant 0 : i32
    return %c0_i32, %c0_i32_0 : i32, i32
  }
  func.func @transform_5(%arg0: i32) -> (i32, i32) {
    %c0_i32 = arith.constant 0 : i32
    %c0_i32_0 = arith.constant 0 : i32
    %c0_i32_1 = arith.constant 0 : i32
    return %c0_i32, %c0_i32_0 : i32, i32
  }
  func.func @transform_6(%arg0: i32) -> (i32, i32) {
    %c0_i32 = arith.constant 0 : i32
    %c0_i32_0 = arith.constant 0 : i32
    %c0_i32_1 = arith.constant 0 : i32
    return %c0_i32, %c0_i32_0 : i32, i32
  }
  func.func @transform_7(%arg0: i32) -> (i32, i32) {
    %c0_i32 = arith.constant 0 : i32
    %c0_i32_0 = arith.constant 0 : i32
    return %c0_i32, %arg0 : i32, i32
  }
}

</mosaic_0001>

<bundles_post_ra>
// kernel: qpredictor_forward_t.1
= control target key start
LH: loop header
LB: loop body
LE: loop exit
PB: predicated region body
PF: predicated region fallthrough
CT: control target
= control target key end

     0   :  { %vm51_vm0 = vcmask 1041408   ;;  %vm44_vm1 = vcmask 15360   ;;  %v368_v3 = vmov 0   ;;  %vm144_vm2 = vcmask 130048   ;;  %s451_s0 = inlined_call_operand.vmem [shape: f32[2,128], index: 0, kind: input, shape index: {}]   ;;  %s452_s1 = inlined_call_operand.vmem [shape: f32[16,2], index: 1, kind: input, shape index: {}]   ;;  %s453_s2 = inlined_call_operand.vmem [shape: f32[16,1], index: 2, kind: input, shape index: {}]   ;;  %s454_s6 = inlined_call_operand.vmem [shape: f32[8,1], index: 6, kind: input, shape index: {}]   ;;  %s455_s3 = inlined_call_operand.vmem [shape: f32[16,16], index: 3, kind: input, shape index: {}]   ;;  %s456_s4 = inlined_call_operand.vmem [shape: f32[16,1], index: 4, kind: input, shape index: {}]   ;;  %s457_s5 = inlined_call_operand.vmem [shape: f32[8,16], index: 5, kind: input, shape index: {}]   ;;  %s458_s7 = inlined_call_operand.vmem [shape: f32[8,128], index: 7, kind: output, shape index: {}]  }
   0x1   :  { %v26_v0 = vld [vmem:[%s451_s0] sm:$0x3]  ;;  %v28_v2 = vld [vmem:[%s452_s1 + $0x8] sm:$0xff]  ;;  %358 = vset.pattern.permute.xlu0 %v368_v3  ;;  %359 = vset.pattern.permute.xlu1 %v368_v3  ;;  %v369_v20 = vmov 0.0|0.0   ;;  %vm370_vm3 = vmmov 0   ;;  %v371_v21 = vmov 0.0  }
   0x2   :  { %v27_v1 = vld [vmem:[%s452_s1] sm:$0xff]  ;;  %328 = vmatprep.subr.msk.mxu0 %vm51_vm0, %v26_v0  ;;  %v33_v5 = vld [vmem:[%s453_s2 + $0x8] sm:$0xff] }
   0x3   :  { %330 = vmatprep.mubr.msk.f32.mxu0 %vm44_vm1, %v27_v1  ;;  %v32_v4 = vld [vmem:[%s453_s2] sm:$0xff]  ;;  %329 = vmatpush3.msk.msra.mxu0 %vm51_vm0, %v26_v0  ;;  %v133_v9 = vld [vmem:[%s456_s4 + $0x8] sm:$0xff] }
   0x4   :  { %36 = vperm.xlu0 %358, %v32_v4   ;;  %331 = vmatmul.mubr.msk.f32.vlgmr.msra.gmra.mrb[0].mxu0 %vm44_vm1, %v28_v2  ;;  %v228_v6 = vld [vmem:[%s454_s6] sm:$0xff]  ;;  %v30_v19 = vld [vmem:[%s455_s3 + $0x8] sm:$0xff] }
   0x5   :  { %v29_v7 = vld [vmem:[%s455_s3] sm:$0xff]  ;;  %351 = vmatprep.subr.bf16.mxu0 %v369_v20  ;;  %344 = vmatprep.mubr.msk.f32.mxu0 %vm370_vm3, %v371_v21 }
   0x6   :  { %337 = vmatprep.mubr.msk.f32.mxu1 %vm144_vm2, %v29_v7  ;;  %v132_v8 = vld [vmem:[%s456_s4] sm:$0xff] }
   0x7   :  { %136 = vperm.xlu1 %359, %v132_v8   ;;  %v31_v31 = vld [vmem:[%s457_s5] sm:$0xff] }
   0x8   :  { %41 = vperm.xlu0 %358, %v33_v5  }
   0xb   :  { %141 = vperm.xlu1 %359, %v133_v9  }
   0xc   :  { %231 = vperm.xlu0 %358, %v228_v6  }
  0x83   :  { %v37_v10 = vpop.permute.xlu0 %36 }
  0x86   :  { %v137_v22 = vpop.permute.xlu1 %136 }
  0x87   :  { %v42_v11 = vpop.permute.xlu0 %41 }
  0x8a   :  { %v142_v23 = vpop.permute.xlu1 %141 }
  0x8b   :  { %v232_v32 = vpop.permute.xlu0 %231 }
  0xd7   :  { %v332_v12 = vpop.f32.mrb[0].mxu0 }
  0xd8   :  { %v127_v13 = vadd.f32 %v332_v12, %v42_v11  ;;  %v121_v14 = vpop.f32.mrb[1].mxu0 }
  0xd9   :  { %v122_v15 = vadd.f32 %v121_v14, %v37_v10 }
  0xda   :  { %360 = vtanh.f32 %v127_v13 }
  0xdb   :  { %362 = vtanh.f32 %v122_v15 }
  0xe4   :  { %v361_v16 = vpop.eup %360 }
  0xe5   :  { %v363_v17 = vpop.eup %362 }
  0xe6   :  { %v347_v18 = vpack.c.bf16 %v361_v16, %v363_v17 }
  0xe8   :  { %348 = vmatprep.subr.bf16.mxu1 %v347_v18 }
  0xe9   :  { %350 = vmatpush3.bf16.msra.mxu1 %v347_v18 }
  0xec   :  { %338 = vmatmul.mubr.msk.f32.vlgmr.msra.gmra.mrb[0].mxu1 %vm144_vm2, %v30_v19 }
 0x1bf   :  { %v339_v24 = vpop.f32.mrb[0].mxu1 }
 0x1c0   :  { %v223_v25 = vadd.f32 %v339_v24, %v142_v23  ;;  %v217_v26 = vpop.f32.mrb[1].mxu1 }
 0x1c1   :  { %v218_v27 = vadd.f32 %v217_v26, %v137_v22 }
 0x1c2   :  { %364 = vtanh.f32 %v223_v25 }
 0x1c3   :  { %366 = vtanh.f32 %v218_v27 }
 0x1cc   :  { %v365_v28 = vpop.eup %364 }
 0x1cd   :  { %v367_v29 = vpop.eup %366 }
 0x1ce   :  { %v352_v30 = vpack.c.bf16 %v365_v28, %v367_v29 }
 0x1d0   :  { %353 = vmatpush3.bf16.msra.mxu0 %v352_v30 }
 0x1d3   :  { %345 = vmatmul.mubr.msk.f32.vlgmr.msra.gmra.mrb[2].mxu0 %vm144_vm2, %v31_v31 }
 0x2a6   :  { %v303_v33 = vpop.f32.mrb[2].mxu0 }
 0x2a7   :  { %v304_v34 = vadd.f32 %v303_v33, %v232_v32  ;;  %v346_v35 = vpop.f32.mrb[3].mxu0 }
 0x2a9   :  { %307 = vst [vmem:[%s458_s7] sm:$0xff] %v304_v34 }

</bundles_post_ra>
